<compile_context>
chip_gen: v7x
topology: tpu7x:2x2x1
jax: 0.10.0
libtpu: 0.0.40
codegen_flags: <defaults>
</compile_context>

<pallas_src>
import functools

import jax
import jax.numpy as jnp
from jax.experimental import pallas as pl
from jax.experimental.pallas import tpu as pltpu


# ----------------------------- Pallas kernels ------------------------------

def _matmul_bias_kernel(x_ref, w_ref, b_ref, o_ref, *, relu):
    acc = jnp.dot(x_ref[...], w_ref[...], preferred_element_type=jnp.float32)
    acc = acc + b_ref[...].astype(jnp.float32)
    if relu:
        acc = jnp.maximum(acc, 0.0)
    o_ref[...] = acc.astype(o_ref.dtype)


def matmul_bias(x, w, b2, *, relu=False, out_dtype=jnp.float32, tm=1024):
    """x: [M, K], w: [K, N], b2: [1, N] -> [M, N].

    Tiled over M (parallel grid axis); K and N stay resident (K <= 1152,
    N <= 512 here, so the weight tile is tiny). bf16 operands take the MXU
    fast path; accumulation is f32.  tm=1024 amortizes per-grid-step overhead
    while staying well inside the scoped VMEM budget on v5e/v6e/v7x.
    """
    M, K = x.shape
    Nout = w.shape[1]
    tm = min(tm, M)
    grid_m = pl.cdiv(M, tm)
    flops = 2 * M * K * Nout
    bytes_accessed = (M * K * x.dtype.itemsize
                      + K * Nout * w.dtype.itemsize
                      + Nout * b2.dtype.itemsize
                      + M * Nout * jnp.dtype(out_dtype).itemsize)
    return pl.pallas_call(
        functools.partial(_matmul_bias_kernel, relu=relu),
        out_shape=jax.ShapeDtypeStruct((M, Nout), out_dtype),
        grid_spec=pltpu.PrefetchScalarGridSpec(
            num_scalar_prefetch=0,
            grid=(grid_m,),
            in_specs=[
                pl.BlockSpec((tm, K), lambda i: (i, 0)),
                pl.BlockSpec((K, Nout), lambda i: (0, 0)),
                pl.BlockSpec((1, Nout), lambda i: (0, 0)),
            ],
            out_specs=pl.BlockSpec((tm, Nout), lambda i: (i, 0)),
        ),
        compiler_params=pltpu.CompilerParams(
            dimension_semantics=("parallel",),
            vmem_limit_bytes=32 * 1024 * 1024),
        cost_estimate=pl.CostEstimate(flops=flops, transcendentals=0,
                                      bytes_accessed=bytes_accessed),
    )(x, w, b2)


def _layernorm_kernel(x_ref, g_ref, b_ref, o_ref):
    x = x_ref[...].astype(jnp.float32)
    mean = jnp.mean(x, axis=-1, keepdims=True)
    var = jnp.mean(jnp.square(x - mean), axis=-1, keepdims=True)  # biased, like torch
    inv = jax.lax.rsqrt(var + 1e-5)
    o_ref[...] = ((x - mean) * inv * g_ref[...] + b_ref[...]).astype(o_ref.dtype)


def layernorm(x2d, gamma2, beta2, *, out_dtype=jnp.float32, tm=1024):
    """x2d: [M, F]; LayerNorm over the last dim F (eps = 1e-5), f32 stats."""
    M, F = x2d.shape
    tm = min(tm, M)
    grid_m = pl.cdiv(M, tm)
    return pl.pallas_call(
        _layernorm_kernel,
        out_shape=jax.ShapeDtypeStruct((M, F), out_dtype),
        grid_spec=pltpu.PrefetchScalarGridSpec(
            num_scalar_prefetch=0,
            grid=(grid_m,),
            in_specs=[
                pl.BlockSpec((tm, F), lambda i: (i, 0)),
                pl.BlockSpec((1, F), lambda i: (0, 0)),
                pl.BlockSpec((1, F), lambda i: (0, 0)),
            ],
            out_specs=pl.BlockSpec((tm, F), lambda i: (i, 0)),
        ),
        compiler_params=pltpu.CompilerParams(dimension_semantics=("parallel",)),
    )(x2d, gamma2, beta2)


def _gru_step_kernel(gi_ref, whh_ref, bhh_ref, pw_ref, pb_ref, out_ref, h_ref, *, H):
    """One GRU timestep per grid iteration; h carried in VMEM scratch.

    gi_ref: (1, N, 3H) bf16 per-step tile of the precomputed input projection;
    whh_ref: (H, 3H) bf16; bhh_ref: (1, 3H) f32; pw_ref: (H, gin) bf16;
    pb_ref: (1, gin) f32; out_ref: (N, gin) f32 (written on the last step).
    """
    t = pl.program_id(0)

    @pl.when(t == 0)
    def _():
        h_ref[...] = jnp.zeros_like(h_ref)

    h = h_ref[...]                                       # (N, H) f32 state
    gi = gi_ref[0].astype(jnp.float32)                   # (N, 3H)
    # Recurrent matmul with bf16 MXU operands, f32 accumulation.
    gh = jnp.dot(h.astype(jnp.bfloat16), whh_ref[...],
                 preferred_element_type=jnp.float32) + bhh_ref[...].astype(jnp.float32)
    r = jax.nn.sigmoid(gi[:, :H] + gh[:, :H])
    z = jax.nn.sigmoid(gi[:, H:2 * H] + gh[:, H:2 * H])
    n = jnp.tanh(gi[:, 2 * H:] + r * gh[:, 2 * H:])      # b_hn inside r*(.) like torch
    h_new = (1.0 - z) * n + z * h
    h_ref[...] = h_new

    @pl.when(t == pl.num_programs(0) - 1)
    def _():
        # Fused output projection: proj(h_T).
        out_ref[...] = (jnp.dot(h_new.astype(jnp.bfloat16), pw_ref[...],
                                preferred_element_type=jnp.float32)
                        + pb_ref[...].astype(jnp.float32)).astype(out_ref.dtype)


def gru_final_proj(gi_tnf, whh_t, bhh2, proj_w_t, proj_b2):
    """gi_tnf: [T, N, 3H] bf16 (precomputed x@Wih^T + bih); returns proj(h_T): [N, gin]."""
    T, N, threeH = gi_tnf.shape
    H = threeH // 3
    gin = proj_w_t.shape[1]
    return pl.pallas_call(
        functools.partial(_gru_step_kernel, H=H),
        out_shape=jax.ShapeDtypeStruct((N, gin), jnp.float32),
        grid_spec=pltpu.PrefetchScalarGridSpec(
            num_scalar_prefetch=0,
            grid=(T,),
            in_specs=[
                pl.BlockSpec((1, N, threeH), lambda t: (t, 0, 0)),
                pl.BlockSpec((H, threeH), lambda t: (0, 0)),
                pl.BlockSpec((1, threeH), lambda t: (0, 0)),
                pl.BlockSpec((H, gin), lambda t: (0, 0)),
                pl.BlockSpec((1, gin), lambda t: (0, 0)),
            ],
            out_specs=pl.BlockSpec((N, gin), lambda t: (0, 0)),
            scratch_shapes=[pltpu.VMEM((N, H), jnp.float32)],
        ),
        compiler_params=pltpu.CompilerParams(
            dimension_semantics=("arbitrary",)),
    )(gi_tnf, whh_t, bhh2, proj_w_t, proj_b2)


# ------------------------------- glue (JAX) --------------------------------

def conv2d_s2p1_relu_nhwc(x, wmat, b2, cout):
    """3x3 conv, stride 2, pad 1, + ReLU, NHWC.

    x: [N, H, W, Cin] (bf16); wmat: [9*Cin, Cout] bf16 with row order
    (kh, kw, ci) == torch weight.transpose(2,3,1,0).reshape(9*Cin, Cout);
    b2: [1, Cout] f32. Returns [N, Ho, Wo, Cout] bf16.
    """
    N, H, W, Cin = x.shape
    Ho = (H - 3 + 2) // 2 + 1
    Wo = (W - 3 + 2) // 2 + 1
    xp = jnp.pad(x, ((0, 0), (1, 1), (1, 1), (0, 0)))
    taps = []
    for kh in range(3):
        for kw in range(3):
            taps.append(
                xp[:, kh:kh + 2 * Ho - 1:2, kw:kw + 2 * Wo - 1:2, :])
    # concatenate keeps Cin lane-contiguous per tap (column = (kh*3+kw)*Cin+ci)
    # and is a pure copy (no interleaving transpose like stack+reshape).
    patches = jnp.concatenate(taps, axis=-1).reshape(N * Ho * Wo, 9 * Cin)
    out = matmul_bias(patches, wmat, b2, relu=True, out_dtype=jnp.bfloat16)
    return out.reshape(N, Ho, Wo, cout)


def calculate_channels(L, kernel_size, stride, pad, n_convs):
    for _ in range(n_convs):
        L = (L - kernel_size + 2 * pad) // stride + 1
    return L


def reference_encoder_forward(params, inputs):
    """inputs: [N, Ty, spec_channels] -> [N, gin_channels]."""
    N, Ty, F = inputs.shape
    # LayerNorm over spec_channels (f32 stats), bf16 output for the conv stack.
    x = layernorm(inputs.reshape(N * Ty, F), params["ln_g"], params["ln_b"],
                  out_dtype=jnp.bfloat16)
    x = x.reshape(N, Ty, F, 1)                           # NHWC, Cin = 1
    # conv stack
    for (wmat, b2, cout) in params["convs"]:
        x = conv2d_s2p1_relu_nhwc(x, wmat, b2, cout)     # [N, T', F', C] bf16
    N2, Tp = x.shape[0], x.shape[1]
    # torch's (C, F') flatten permutation is folded into gru_wih_t rows at
    # init, so a plain reshape feeds the gi matmul (no minor-dim transpose).
    feats = x.reshape(N2, Tp, -1)
    D = feats.shape[-1]
    # GRU input projection hoisted out of the recurrence: one big MXU matmul,
    # stored bf16 to halve its HBM round trip into the scan kernel.
    gi = matmul_bias(feats.reshape(N2 * Tp, D), params["gru_wih_t"],
                     params["gru_bih"], relu=False, out_dtype=jnp.bfloat16)
    gi = gi.reshape(N2, Tp, -1).transpose(1, 0, 2)       # tiny [T', N, 3H] reorder
    # Sequential recurrence, one timestep per grid step, projection fused.
    return gru_final_proj(gi, params["gru_whh_t"], params["gru_bhh"],
                          params["proj_w_t"], params["proj_b"])


def init_params(key, spec_channels, gin_channels):
    ref_enc_filters = [32, 32, 64, 64, 128, 128]
    filters = [1] + ref_enc_filters
    keys = jax.random.split(key, 32)
    ki = 0
    params = {
        "ln_g": jnp.ones((1, spec_channels), jnp.float32),
        "ln_b": jnp.zeros((1, spec_channels), jnp.float32),
    }
    convs = []
    for i in range(len(ref_enc_filters)):
        cin, cout = filters[i], filters[i + 1]
        # weight_norm folded: effective weight == initialized weight at init.
        w = 0.1 * jax.random.normal(keys[ki], (cout, cin, 3, 3), jnp.float32); ki += 1
        b = 0.1 * jax.random.normal(keys[ki], (cout,), jnp.float32); ki += 1
        # Row order (kh, kw, ci) matches the concatenate-built patch columns;
        # pre-reshape and pre-cast to bf16 once at init.
        wmat = w.transpose(2, 3, 1, 0).reshape(9 * cin, cout).astype(jnp.bfloat16)
        convs.append((wmat, b.reshape(1, cout), cout))
    params["convs"] = convs
    out_ch = calculate_channels(spec_channels, 3, 2, 1, len(ref_enc_filters))
    C = ref_enc_filters[-1]
    D = C * out_ch
    H = 256 // 2
    wih = 0.1 * jax.random.normal(keys[ki], (3 * H, D), jnp.float32); ki += 1
    whh = 0.1 * jax.random.normal(keys[ki], (3 * H, H), jnp.float32); ki += 1
    # torch flattens the conv output in (c, f') order; our NHWC reshape gives
    # (f', c).  Fold that permutation into the rows of Wih^T once at init.
    wih_t = wih.T.reshape(C, out_ch, 3 * H).transpose(1, 0, 2).reshape(D, 3 * H)
    params["gru_wih_t"] = wih_t.astype(jnp.bfloat16)      # [D, 3H] bf16 (MXU)
    params["gru_whh_t"] = whh.T.astype(jnp.bfloat16)      # [H, 3H] bf16 (MXU)
    params["gru_bih"] = (0.1 * jax.random.normal(keys[ki], (3 * H,), jnp.float32)
                         ).reshape(1, 3 * H); ki += 1
    params["gru_bhh"] = (0.1 * jax.random.normal(keys[ki], (3 * H,), jnp.float32)
                         ).reshape(1, 3 * H); ki += 1
    pw = 0.1 * jax.random.normal(keys[ki], (gin_channels, H), jnp.float32); ki += 1
    params["proj_w_t"] = pw.T.astype(jnp.bfloat16)        # [H, gin] bf16 (MXU)
    params["proj_b"] = (0.1 * jax.random.normal(keys[ki], (gin_channels,), jnp.float32)
                        ).reshape(1, gin_channels); ki += 1
    return params


if __name__ == "__main__":
    spec_channels = 32
    gin_channels = 32
    N, Ty = 2, 128                                   # Ty=128 -> T'=2 GRU steps; F'=1

    key = jax.random.PRNGKey(0)
    pkey, xkey = jax.random.split(key)
    params = init_params(pkey, spec_channels, gin_channels)
    inputs = jax.random.normal(xkey, (N, Ty, spec_channels), jnp.float32)

    out = reference_encoder_forward(params, inputs)
    out = jax.block_until_ready(out)
    assert out.shape == (N, gin_channels), out.shape
    assert bool(jnp.all(jnp.isfinite(out)))
    print("KERNEL_OK")
</pallas_src>

<mosaic_0001>
module attributes {stable_mosaic.version = 11 : i64} {
  func.func @_layernorm_kernel(%arg0: i32, %arg1: memref<256x32xf32, #tpu.memory_space<vmem>>, %arg2: memref<1x32xf32, #tpu.memory_space<vmem>>, %arg3: memref<1x32xf32, #tpu.memory_space<vmem>>, %arg4: memref<256x32xbf16, #tpu.memory_space<vmem>>) attributes {dimension_semantics = [#tpu.dimension_semantics<parallel>], iteration_bounds = array<i64: 1>, scalar_prefetch = 0 : i64, scratch_operands = 0 : i64, tpu.core_type = #tpu.core_type<tc>, window_params = [{transform_indices = @transform_0, window_bounds = array<i64: 256, 32>}, {pipeline_mode = #tpu.pipeline_mode<synchronous>, transform_indices = @transform_1, window_bounds = array<i64: 1, 32>}, {pipeline_mode = #tpu.pipeline_mode<synchronous>, transform_indices = @transform_2, window_bounds = array<i64: 1, 32>}, {transform_indices = @transform_3, window_bounds = array<i64: 256, 32>}]} {
    %c0 = arith.constant 0 : index
    %c0_0 = arith.constant 0 : index
    %0 = vector.load %arg1[%c0, %c0_0] : memref<256x32xf32, #tpu.memory_space<vmem>>, vector<256x32xf32>
    %cst = arith.constant dense<0.000000e+00> : vector<256xf32>
    %1 = vector.multi_reduction <add>, %0, %cst [1] : vector<256x32xf32> to vector<256xf32>
    %2 = vector.shape_cast %1 : vector<256xf32> to vector<256x1xf32>
    %cst_1 = arith.constant 3.200000e+01 : f32
    %3 = vector.broadcast %cst_1 : f32 to vector<256x1xf32>
    %4 = arith.divf %2, %3 : vector<256x1xf32>
    %5 = vector.broadcast %4 : vector<256x1xf32> to vector<256x32xf32>
    %6 = arith.subf %0, %5 : vector<256x32xf32>
    %7 = arith.mulf %6, %6 : vector<256x32xf32>
    %cst_2 = arith.constant dense<0.000000e+00> : vector<256xf32>
    %8 = vector.multi_reduction <add>, %7, %cst_2 [1] : vector<256x32xf32> to vector<256xf32>
    %9 = vector.shape_cast %8 : vector<256xf32> to vector<256x1xf32>
    %cst_3 = arith.constant 3.200000e+01 : f32
    %10 = vector.broadcast %cst_3 : f32 to vector<256x1xf32>
    %11 = arith.divf %9, %10 : vector<256x1xf32>
    %cst_4 = arith.constant 9.99999974E-6 : f32
    %12 = vector.broadcast %cst_4 : f32 to vector<256x1xf32>
    %13 = arith.addf %11, %12 : vector<256x1xf32>
    %14 = math.rsqrt %13 : vector<256x1xf32>
    %15 = vector.broadcast %4 : vector<256x1xf32> to vector<256x32xf32>
    %16 = arith.subf %0, %15 : vector<256x32xf32>
    %17 = vector.broadcast %14 : vector<256x1xf32> to vector<256x32xf32>
    %18 = arith.mulf %16, %17 : vector<256x32xf32>
    %c0_5 = arith.constant 0 : index
    %c0_6 = arith.constant 0 : index
    %19 = vector.load %arg2[%c0_5, %c0_6] : memref<1x32xf32, #tpu.memory_space<vmem>>, vector<1x32xf32>
    %20 = vector.broadcast %19 : vector<1x32xf32> to vector<256x32xf32>
    %21 = arith.mulf %18, %20 : vector<256x32xf32>
    %c0_7 = arith.constant 0 : index
    %c0_8 = arith.constant 0 : index
    %22 = vector.load %arg3[%c0_7, %c0_8] : memref<1x32xf32, #tpu.memory_space<vmem>>, vector<1x32xf32>
    %23 = vector.broadcast %22 : vector<1x32xf32> to vector<256x32xf32>
    %24 = arith.addf %21, %23 : vector<256x32xf32>
    %25 = arith.truncf %24 : vector<256x32xf32> to vector<256x32xbf16>
    %c0_9 = arith.constant 0 : index
    %c0_10 = arith.constant 0 : index
    %26 = vector.load %arg4[%c0_9, %c0_10] : memref<256x32xbf16, #tpu.memory_space<vmem>>, vector<256x32xbf16>
    tpu.vector_store %arg4[%c0_9, %c0_10], %25 {strides = array<i32>} : memref<256x32xbf16, #tpu.memory_space<vmem>>, vector<256x32xbf16>,
    return
  }
  func.func @transform_0(%arg0: i32) -> (i32, i32) {
    %c0_i32 = arith.constant 0 : i32
    %c0_i32_0 = arith.constant 0 : i32
    return %arg0, %c0_i32 : i32, i32
  }
  func.func @transform_1(%arg0: i32) -> (i32, i32) {
    %c0_i32 = arith.constant 0 : i32
    %c0_i32_0 = arith.constant 0 : i32
    %c0_i32_1 = arith.constant 0 : i32
    return %c0_i32, %c0_i32_0 : i32, i32
  }
  func.func @transform_2(%arg0: i32) -> (i32, i32) {
    %c0_i32 = arith.constant 0 : i32
    %c0_i32_0 = arith.constant 0 : i32
    %c0_i32_1 = arith.constant 0 : i32
    return %c0_i32, %c0_i32_0 : i32, i32
  }
  func.func @transform_3(%arg0: i32) -> (i32, i32) {
    %c0_i32 = arith.constant 0 : i32
    %c0_i32_0 = arith.constant 0 : i32
    return %arg0, %c0_i32 : i32, i32
  }
}

</mosaic_0001>

<bundles_post_ra>
// kernel: tpu_custom_call.1
= control target key start
LH: loop header
LB: loop body
LE: loop exit
PB: predicated region body
PF: predicated region fallthrough
CT: control target
= control target key end

     0   :  { %vm46_vm0 = vcmask 261120   ;;  %vm670_vm1 = vcmask 257024   ;;  %s1507_s0 = inlined_call_operand.vmem [shape: f32[256,32], index: 0, kind: input, shape index: {}]   ;;  %s1508_s1 = inlined_call_operand.vmem [shape: f32[1,32], index: 1, kind: input, shape index: {}]   ;;  %s1509_s2 = inlined_call_operand.vmem [shape: f32[1,32], index: 2, kind: input, shape index: {}]   ;;  %s1510_s3 = inlined_call_operand.vmem [shape: bf16[256,32], index: 3, kind: output, shape index: {}]  }
   0x1   :  { %v860_v0 = vld [vmem:[%s1507_s0] sm:$0xff]  ;;  %v865_v1 = vld [vmem:[%s1507_s0 + $0x10] sm:$0xff]  ;;  %v870_v2 = vld [vmem:[%s1507_s0 + $0x8] sm:$0xff] }
   0x2   :  { %v47_v3 = vsel %vm46_vm0, %v860_v0, 0.0  ;;  %v53_v4 = vsel %vm46_vm0, %v865_v1, 0.0  ;;  %v879_v5 = vld [vmem:[%s1507_s0 + $0x18] sm:$0xff]  ;;  %v50_v6 = vsel %vm46_vm0, %v870_v2, 0.0  ;;  %v888_v8 = vld [vmem:[%s1507_s0 + $0x20] sm:$0xff]  ;;  %v893_v9 = vld [vmem:[%s1507_s0 + $0x28] sm:$0xff] }
   0x3   :  { %48 = vadd.xlane.f32.xlu0 %v47_v3  ;;  %54 = vadd.xlane.f32.xlu1 %v53_v4  ;;  %v56_v7 = vsel %vm46_vm0, %v879_v5, 0.0  ;;  %v59_v10 = vsel %vm46_vm0, %v888_v8, 0.0  ;;  %v62_v11 = vsel %vm46_vm0, %v893_v9, 0.0  ;;  %v902_v12 = vld [vmem:[%s1507_s0 + $0x30] sm:$0xff]  ;;  %v907_v13 = vld [vmem:[%s1507_s0 + $0x38] sm:$0xff]  ;;  %v916_v16 = vld [vmem:[%s1507_s0 + $0x40] sm:$0xff] }
   0x4   :  { %v65_v14 = vsel %vm46_vm0, %v902_v12, 0.0  ;;  %v68_v15 = vsel %vm46_vm0, %v907_v13, 0.0  ;;  %v921_v17 = vld [vmem:[%s1507_s0 + $0x48] sm:$0xff]  ;;  %v71_v18 = vsel %vm46_vm0, %v916_v16, 0.0  ;;  %v930_v20 = vld [vmem:[%s1507_s0 + $0x50] sm:$0xff]  ;;  %v935_v21 = vld [vmem:[%s1507_s0 + $0x58] sm:$0xff] }
   0x5   :  { %v74_v19 = vsel %vm46_vm0, %v921_v17, 0.0  ;;  %v77_v22 = vsel %vm46_vm0, %v930_v20, 0.0  ;;  %v80_v23 = vsel %vm46_vm0, %v935_v21, 0.0  ;;  %v944_v24 = vld [vmem:[%s1507_s0 + $0x60] sm:$0xff]  ;;  %v949_v25 = vld [vmem:[%s1507_s0 + $0x68] sm:$0xff]  ;;  %v958_v28 = vld [vmem:[%s1507_s0 + $0x70] sm:$0xff] }
   0x6   :  { %v83_v26 = vsel %vm46_vm0, %v944_v24, 0.0  ;;  %v86_v27 = vsel %vm46_vm0, %v949_v25, 0.0  ;;  %v963_v29 = vld [vmem:[%s1507_s0 + $0x78] sm:$0xff]  ;;  %v89_v30 = vsel %vm46_vm0, %v958_v28, 0.0  ;;  %v972_v32 = vld [vmem:[%s1507_s0 + $0x80] sm:$0xff]  ;;  %v977_v33 = vld [vmem:[%s1507_s0 + $0x88] sm:$0xff] }
   0x7   :  { %51 = vadd.xlane.f32.xlu0 %v50_v6  ;;  %57 = vadd.xlane.f32.xlu1 %v56_v7  ;;  %v92_v31 = vsel %vm46_vm0, %v963_v29, 0.0  ;;  %v95_v34 = vsel %vm46_vm0, %v972_v32, 0.0  ;;  %v98_v35 = vsel %vm46_vm0, %v977_v33, 0.0  ;;  %v986_v36 = vld [vmem:[%s1507_s0 + $0x90] sm:$0xff]  ;;  %v991_v37 = vld [vmem:[%s1507_s0 + $0x98] sm:$0xff]  ;;  %v1000_v40 = vld [vmem:[%s1507_s0 + $0xa0] sm:$0xff] }
   0x8   :  { %v101_v38 = vsel %vm46_vm0, %v986_v36, 0.0  ;;  %v104_v39 = vsel %vm46_vm0, %v991_v37, 0.0  ;;  %v1005_v41 = vld [vmem:[%s1507_s0 + $0xa8] sm:$0xff]  ;;  %v107_v42 = vsel %vm46_vm0, %v1000_v40, 0.0  ;;  %v1014_v44 = vld [vmem:[%s1507_s0 + $0xb0] sm:$0xff]  ;;  %v1019_v45 = vld [vmem:[%s1507_s0 + $0xb8] sm:$0xff] }
   0x9   :  { %v110_v43 = vsel %vm46_vm0, %v1005_v41, 0.0  ;;  %v113_v46 = vsel %vm46_vm0, %v1014_v44, 0.0  ;;  %v116_v47 = vsel %vm46_vm0, %v1019_v45, 0.0  ;;  %v1028_v48 = vld [vmem:[%s1507_s0 + $0xc0] sm:$0xff]  ;;  %v1033_v49 = vld [vmem:[%s1507_s0 + $0xc8] sm:$0xff]  ;;  %v1042_v52 = vld [vmem:[%s1507_s0 + $0xd0] sm:$0xff] }
   0xa   :  { %v119_v50 = vsel %vm46_vm0, %v1028_v48, 0.0  ;;  %v122_v51 = vsel %vm46_vm0, %v1033_v49, 0.0  ;;  %v1047_v53 = vld [vmem:[%s1507_s0 + $0xd8] sm:$0xff]  ;;  %v125_v54 = vsel %vm46_vm0, %v1042_v52, 0.0  ;;  %v1056_v56 = vld [vmem:[%s1507_s0 + $0xe0] sm:$0xff]  ;;  %v1061_v57 = vld [vmem:[%s1507_s0 + $0xe8] sm:$0xff] }
   0xb   :  { %60 = vadd.xlane.f32.xlu0 %v59_v10  ;;  %63 = vadd.xlane.f32.xlu1 %v62_v11  ;;  %v128_v55 = vsel %vm46_vm0, %v1047_v53, 0.0  ;;  %v131_v58 = vsel %vm46_vm0, %v1056_v56, 0.0  ;;  %v134_v59 = vsel %vm46_vm0, %v1061_v57, 0.0  ;;  %v1070_v60 = vld [vmem:[%s1507_s0 + $0xf0] sm:$0xff]  ;;  %v1075_v61 = vld [vmem:[%s1507_s0 + $0xf8] sm:$0xff] }
   0xc   :  { %v137_v62 = vsel %vm46_vm0, %v1070_v60, 0.0  ;;  %v140_v63 = vsel %vm46_vm0, %v1075_v61, 0.0 }
   0xf   :  { %66 = vadd.xlane.f32.xlu0 %v65_v14  ;;  %69 = vadd.xlane.f32.xlu1 %v68_v15 }
  0x13   :  { %72 = vadd.xlane.f32.xlu0 %v71_v18  ;;  %75 = vadd.xlane.f32.xlu1 %v74_v19 }
  0x17   :  { %78 = vadd.xlane.f32.xlu0 %v77_v22  ;;  %81 = vadd.xlane.f32.xlu1 %v80_v23 }
  0x1b   :  { %84 = vadd.xlane.f32.xlu0 %v83_v26  ;;  %87 = vadd.xlane.f32.xlu1 %v86_v27 }
  0x1f   :  { %90 = vadd.xlane.f32.xlu0 %v89_v30  ;;  %93 = vadd.xlane.f32.xlu1 %v92_v31 }
  0x23   :  { %96 = vadd.xlane.f32.xlu0 %v95_v34  ;;  %99 = vadd.xlane.f32.xlu1 %v98_v35 }
  0x27   :  { %102 = vadd.xlane.f32.xlu0 %v101_v38  ;;  %105 = vadd.xlane.f32.xlu1 %v104_v39 }
  0x2b   :  { %108 = vadd.xlane.f32.xlu0 %v107_v42  ;;  %111 = vadd.xlane.f32.xlu1 %v110_v43 }
  0x2f   :  { %114 = vadd.xlane.f32.xlu0 %v113_v46  ;;  %117 = vadd.xlane.f32.xlu1 %v116_v47 }
  0x33   :  { %120 = vadd.xlane.f32.xlu0 %v119_v50  ;;  %123 = vadd.xlane.f32.xlu1 %v122_v51 }
  0x37   :  { %126 = vadd.xlane.f32.xlu0 %v125_v54  ;;  %129 = vadd.xlane.f32.xlu1 %v128_v55 }
  0x3b   :  { %132 = vadd.xlane.f32.xlu0 %v131_v58  ;;  %135 = vadd.xlane.f32.xlu1 %v134_v59 }
  0x3f   :  { %138 = vadd.xlane.f32.xlu0 %v137_v62  ;;  %141 = vadd.xlane.f32.xlu1 %v140_v63 }
  0x90   :  { %v49_v3 = vpop.xlane.xlu0 %48  ;;  %v55_v4 = vpop.xlane.xlu1 %54 }
  0x91   :  { %v144_v6 = vmul.f32 0.03125, %v49_v3  ;;  %v146_v7 = vmul.f32 0.03125, %v55_v4 }
  0x93   :  { %v1082_v10 = vsub.f32 %v860_v0, %v144_v6  ;;  %v1085_v11 = vsub.f32 %v865_v1, %v146_v7 }
  0x94   :  { %v52_v14 = vpop.xlane.xlu0 %51  ;;  %v58_v15 = vpop.xlane.xlu1 %57 }
  0x95   :  { %v145_v18 = vmul.f32 0.03125, %v52_v14  ;;  %v147_v19 = vmul.f32 0.03125, %v58_v15  ;;  %v208_v22 = vmul.f32 %v1082_v10, %v1082_v10  ;;  %v210_v23 = vmul.f32 %v1085_v11, %v1085_v11 }
  0x97   :  { %v1092_v26 = vsub.f32 %v870_v2, %v145_v18  ;;  %v1095_v27 = vsub.f32 %v879_v5, %v147_v19  ;;  %v240_v0 = vsel %vm46_vm0, %v208_v22, 0.0  ;;  %v246_v31 = vsel %vm46_vm0, %v210_v23, 0.0 }
  0x98   :  { %241 = vadd.xlane.f32.xlu0 %v240_v0  ;;  %v61_v1 = vpop.xlane.xlu0 %60  ;;  %v64_v30 = vpop.xlane.xlu1 %63 }
  0x99   :  { %v148_v34 = vmul.f32 0.03125, %v61_v1  ;;  %v149_v35 = vmul.f32 0.03125, %v64_v30  ;;  %v209_v38 = vmul.f32 %v1092_v26, %v1092_v26  ;;  %v211_v39 = vmul.f32 %v1095_v27, %v1095_v27 }
  0x9b   :  { %v1104_v2 = vsub.f32 %v888_v8, %v148_v34  ;;  %v1107_v5 = vsub.f32 %v893_v9, %v149_v35  ;;  %v243_v42 = vsel %vm46_vm0, %v209_v38, 0.0  ;;  %v249_v47 = vsel %vm46_vm0, %v211_v39, 0.0 }
  0x9c   :  { %247 = vadd.xlane.f32.xlu0 %v246_v31  ;;  %244 = vadd.xlane.f32.xlu1 %v243_v42  ;;  %v67_v43 = vpop.xlane.xlu0 %66  ;;  %v70_v46 = vpop.xlane.xlu1 %69 }
  0x9d   :  { %v150_v50 = vmul.f32 0.03125, %v67_v43  ;;  %v151_v51 = vmul.f32 0.03125, %v70_v46  ;;  %v212_v54 = vmul.f32 %v1104_v2, %v1104_v2  ;;  %v213_v8 = vmul.f32 %v1107_v5, %v1107_v5 }
  0x9f   :  { %v1116_v55 = vsub.f32 %v902_v12, %v150_v50  ;;  %v1119_v9 = vsub.f32 %v907_v13, %v151_v51  ;;  %v252_v58 = vsel %vm46_vm0, %v212_v54, 0.0  ;;  %v255_v63 = vsel %vm46_vm0, %v213_v8, 0.0 }
  0xa0   :  { %250 = vadd.xlane.f32.xlu1 %v249_v47  ;;  %253 = vadd.xlane.f32.xlu0 %v252_v58  ;;  %v73_v59 = vpop.xlane.xlu0 %72  ;;  %v76_v62 = vpop.xlane.xlu1 %75 }
  0xa1   :  { %v152_v3 = vmul.f32 0.03125, %v73_v59  ;;  %v153_v4 = vmul.f32 0.03125, %v76_v62  ;;  %v214_v6 = vmul.f32 %v1116_v55, %v1116_v55  ;;  %v215_v12 = vmul.f32 %v1119_v9, %v1119_v9 }
  0xa3   :  { %v1128_v7 = vsub.f32 %v916_v16, %v152_v3  ;;  %v1131_v13 = vsub.f32 %v921_v17, %v153_v4  ;;  %v258_v14 = vsel %vm46_vm0, %v214_v6, 0.0  ;;  %v261_v19 = vsel %vm46_vm0, %v215_v12, 0.0 }
  0xa4   :  { %256 = vadd.xlane.f32.xlu1 %v255_v63  ;;  %259 = vadd.xlane.f32.xlu0 %v258_v14  ;;  %v79_v15 = vpop.xlane.xlu0 %78  ;;  %v82_v18 = vpop.xlane.xlu1 %81 }
  0xa5   :  { %v154_v22 = vmul.f32 0.03125, %v79_v15  ;;  %v155_v23 = vmul.f32 0.03125, %v82_v18  ;;  %v216_v0 = vmul.f32 %v1128_v7, %v1128_v7  ;;  %v217_v16 = vmul.f32 %v1131_v13, %v1131_v13 }
  0xa7   :  { %v1140_v1 = vsub.f32 %v930_v20, %v154_v22  ;;  %v1143_v17 = vsub.f32 %v935_v21, %v155_v23  ;;  %v264_v30 = vsel %vm46_vm0, %v216_v0, 0.0  ;;  %v267_v35 = vsel %vm46_vm0, %v217_v16, 0.0 }
  0xa8   :  { %262 = vadd.xlane.f32.xlu1 %v261_v19  ;;  %265 = vadd.xlane.f32.xlu0 %v264_v30  ;;  %v85_v31 = vpop.xlane.xlu0 %84  ;;  %v88_v34 = vpop.xlane.xlu1 %87 }
  0xa9   :  { %v156_v38 = vmul.f32 0.03125, %v85_v31  ;;  %v157_v39 = vmul.f32 0.03125, %v88_v34  ;;  %v218_v42 = vmul.f32 %v1140_v1, %v1140_v1  ;;  %v219_v20 = vmul.f32 %v1143_v17, %v1143_v17 }
  0xab   :  { %v1152_v43 = vsub.f32 %v944_v24, %v156_v38  ;;  %v1155_v21 = vsub.f32 %v949_v25, %v157_v39  ;;  %v270_v46 = vsel %vm46_vm0, %v218_v42, 0.0  ;;  %v273_v51 = vsel %vm46_vm0, %v219_v20, 0.0 }
  0xac   :  { %268 = vadd.xlane.f32.xlu1 %v267_v35  ;;  %271 = vadd.xlane.f32.xlu0 %v270_v46  ;;  %v91_v47 = vpop.xlane.xlu0 %90  ;;  %v94_v50 = vpop.xlane.xlu1 %93 }
  0xad   :  { %v158_v54 = vmul.f32 0.03125, %v91_v47  ;;  %v159_v8 = vmul.f32 0.03125, %v94_v50  ;;  %v220_v58 = vmul.f32 %v1152_v43, %v1152_v43  ;;  %v221_v24 = vmul.f32 %v1155_v21, %v1155_v21 }
  0xaf   :  { %v1164_v59 = vsub.f32 %v958_v28, %v158_v54  ;;  %v1167_v25 = vsub.f32 %v963_v29, %v159_v8  ;;  %v276_v62 = vsel %vm46_vm0, %v220_v58, 0.0  ;;  %v279_v4 = vsel %vm46_vm0, %v221_v24, 0.0 }
  0xb0   :  { %274 = vadd.xlane.f32.xlu1 %v273_v51  ;;  %277 = vadd.xlane.f32.xlu0 %v276_v62  ;;  %v97_v63 = vpop.xlane.xlu0 %96  ;;  %v100_v3 = vpop.xlane.xlu1 %99 }
  0xb1   :  { %v160_v6 = vmul.f32 0.03125, %v97_v63  ;;  %v161_v12 = vmul.f32 0.03125, %v100_v3  ;;  %v222_v14 = vmul.f32 %v1164_v59, %v1164_v59  ;;  %v223_v28 = vmul.f32 %v1167_v25, %v1167_v25 }
  0xb3   :  { %v1176_v15 = vsub.f32 %v972_v32, %v160_v6  ;;  %v1179_v29 = vsub.f32 %v977_v33, %v161_v12  ;;  %v282_v18 = vsel %vm46_vm0, %v222_v14, 0.0  ;;  %v285_v23 = vsel %vm46_vm0, %v223_v28, 0.0 }
  0xb4   :  { %280 = vadd.xlane.f32.xlu1 %v279_v4  ;;  %283 = vadd.xlane.f32.xlu0 %v282_v18  ;;  %v103_v19 = vpop.xlane.xlu0 %102  ;;  %v106_v22 = vpop.xlane.xlu1 %105 }
  0xb5   :  { %v162_v0 = vmul.f32 0.03125, %v103_v19  ;;  %v163_v16 = vmul.f32 0.03125, %v106_v22  ;;  %v224_v30 = vmul.f32 %v1176_v15, %v1176_v15  ;;  %v225_v32 = vmul.f32 %v1179_v29, %v1179_v29 }
  0xb7   :  { %v1188_v31 = vsub.f32 %v986_v36, %v162_v0  ;;  %v1191_v33 = vsub.f32 %v991_v37, %v163_v16  ;;  %v288_v34 = vsel %vm46_vm0, %v224_v30, 0.0  ;;  %v291_v39 = vsel %vm46_vm0, %v225_v32, 0.0 }
  0xb8   :  { %286 = vadd.xlane.f32.xlu1 %v285_v23  ;;  %289 = vadd.xlane.f32.xlu0 %v288_v34  ;;  %v109_v35 = vpop.xlane.xlu0 %108  ;;  %v112_v38 = vpop.xlane.xlu1 %111 }
  0xb9   :  { %v164_v42 = vmul.f32 0.03125, %v109_v35  ;;  %v165_v20 = vmul.f32 0.03125, %v112_v38  ;;  %v226_v46 = vmul.f32 %v1188_v31, %v1188_v31  ;;  %v227_v36 = vmul.f32 %v1191_v33, %v1191_v33 }
  0xbb   :  { %v1200_v47 = vsub.f32 %v1000_v40, %v164_v42  ;;  %v1203_v37 = vsub.f32 %v1005_v41, %v165_v20  ;;  %v294_v50 = vsel %vm46_vm0, %v226_v46, 0.0  ;;  %v297_v8 = vsel %vm46_vm0, %v227_v36, 0.0 }
  0xbc   :  { %292 = vadd.xlane.f32.xlu1 %v291_v39  ;;  %295 = vadd.xlane.f32.xlu0 %v294_v50  ;;  %v115_v51 = vpop.xlane.xlu0 %114  ;;  %v118_v54 = vpop.xlane.xlu1 %117 }
  0xbd   :  { %v166_v58 = vmul.f32 0.03125, %v115_v51  ;;  %v167_v24 = vmul.f32 0.03125, %v118_v54  ;;  %v228_v62 = vmul.f32 %v1200_v47, %v1200_v47  ;;  %v229_v40 = vmul.f32 %v1203_v37, %v1203_v37 }
  0xbf   :  { %v1212_v63 = vsub.f32 %v1014_v44, %v166_v58  ;;  %v1215_v41 = vsub.f32 %v1019_v45, %v167_v24  ;;  %v300_v3 = vsel %vm46_vm0, %v228_v62, 0.0  ;;  %v303_v12 = vsel %vm46_vm0, %v229_v40, 0.0 }
  0xc0   :  { %298 = vadd.xlane.f32.xlu1 %v297_v8  ;;  %301 = vadd.xlane.f32.xlu0 %v300_v3  ;;  %v121_v4 = vpop.xlane.xlu0 %120  ;;  %v124_v6 = vpop.xlane.xlu1 %123 }
  0xc1   :  { %v168_v14 = vmul.f32 0.03125, %v121_v4  ;;  %v169_v28 = vmul.f32 0.03125, %v124_v6  ;;  %v230_v18 = vmul.f32 %v1212_v63, %v1212_v63  ;;  %v231_v44 = vmul.f32 %v1215_v41, %v1215_v41 }
  0xc3   :  { %v1224_v19 = vsub.f32 %v1028_v48, %v168_v14  ;;  %v1227_v45 = vsub.f32 %v1033_v49, %v169_v28  ;;  %v306_v22 = vsel %vm46_vm0, %v230_v18, 0.0  ;;  %v309_v16 = vsel %vm46_vm0, %v231_v44, 0.0 }
  0xc4   :  { %304 = vadd.xlane.f32.xlu1 %v303_v12  ;;  %307 = vadd.xlane.f32.xlu0 %v306_v22  ;;  %v127_v23 = vpop.xlane.xlu0 %126  ;;  %v130_v0 = vpop.xlane.xlu1 %129 }
  0xc5   :  { %v170_v30 = vmul.f32 0.03125, %v127_v23  ;;  %v171_v32 = vmul.f32 0.03125, %v130_v0  ;;  %v232_v34 = vmul.f32 %v1224_v19, %v1224_v19  ;;  %v233_v48 = vmul.f32 %v1227_v45, %v1227_v45 }
  0xc7   :  { %v1236_v35 = vsub.f32 %v1042_v52, %v170_v30  ;;  %v1239_v49 = vsub.f32 %v1047_v53, %v171_v32  ;;  %v312_v38 = vsel %vm46_vm0, %v232_v34, 0.0  ;;  %v315_v20 = vsel %vm46_vm0, %v233_v48, 0.0 }
  0xc8   :  { %310 = vadd.xlane.f32.xlu1 %v309_v16  ;;  %313 = vadd.xlane.f32.xlu0 %v312_v38  ;;  %v133_v39 = vpop.xlane.xlu0 %132  ;;  %v136_v42 = vpop.xlane.xlu1 %135 }
  0xc9   :  { %v172_v46 = vmul.f32 0.03125, %v133_v39  ;;  %v173_v36 = vmul.f32 0.03125, %v136_v42  ;;  %v234_v50 = vmul.f32 %v1236_v35, %v1236_v35  ;;  %v235_v52 = vmul.f32 %v1239_v49, %v1239_v49 }
  0xcb   :  { %v1248_v51 = vsub.f32 %v1056_v56, %v172_v46  ;;  %v1251_v53 = vsub.f32 %v1061_v57, %v173_v36  ;;  %v318_v54 = vsel %vm46_vm0, %v234_v50, 0.0  ;;  %v321_v24 = vsel %vm46_vm0, %v235_v52, 0.0 }
  0xcc   :  { %316 = vadd.xlane.f32.xlu1 %v315_v20  ;;  %319 = vadd.xlane.f32.xlu0 %v318_v54  ;;  %v139_v8 = vpop.xlane.xlu0 %138  ;;  %v142_v58 = vpop.xlane.xlu1 %141 }
  0xcd   :  { %v174_v62 = vmul.f32 0.03125, %v139_v8  ;;  %v175_v40 = vmul.f32 0.03125, %v142_v58  ;;  %v236_v3 = vmul.f32 %v1248_v51, %v1248_v51  ;;  %v237_v56 = vmul.f32 %v1251_v53, %v1251_v53  ;;  %v1276_v58 = vld [vmem:[%s1508_s1] ss:$0 sm:$0xff] }
  0xcf   :  { %v1260_v4 = vsub.f32 %v1070_v60, %v174_v62  ;;  %v1263_v57 = vsub.f32 %v1075_v61, %v175_v40  ;;  %v324_v6 = vsel %vm46_vm0, %v236_v3, 0.0  ;;  %v327_v12 = vsel %vm46_vm0, %v237_v56, 0.0 }
  0xd0   :  { %322 = vadd.xlane.f32.xlu1 %v321_v24  ;;  %325 = vadd.xlane.f32.xlu0 %v324_v6  ;;  %v1282_v6 = vld [vmem:[%s1509_s2] ss:$0 sm:$0xff] }
  0xd1   :  { %v238_v14 = vmul.f32 %v1260_v4, %v1260_v4  ;;  %v239_v28 = vmul.f32 %v1263_v57, %v1263_v57 }
  0xd3   :  { %v330_v18 = vsel %vm46_vm0, %v238_v14, 0.0  ;;  %v333_v60 = vsel %vm46_vm0, %v239_v28, 0.0 }
  0xd4   :  { %328 = vadd.xlane.f32.xlu1 %v327_v12  ;;  %331 = vadd.xlane.f32.xlu0 %v330_v18 }
  0xd8   :  { %334 = vadd.xlane.f32.xlu1 %v333_v60 }
 0x125   :  { %v242_v61 = vpop.xlane.xlu0 %241 }
 0x126   :  { %v336_v44 = vmul.f32 0.03125, %v242_v61 }
 0x128   :  { %v368_v22 = vadd.f32 1e-05, %v336_v44 }
 0x129   :  { %v245_v23 = vpop.xlane.xlu1 %244  ;;  %v248_v0 = vpop.xlane.xlu0 %247 }
 0x12a   :  { %773 = vrsqrt.f32 %v368_v22  ;;  %v337_v16 = vmul.f32 0.03125, %v245_v23  ;;  %v338_v30 = vmul.f32 0.03125, %v248_v0 }
 0x12c   :  { %v369_v32 = vadd.f32 1e-05, %v337_v16  ;;  %v370_v34 = vadd.f32 1e-05, %v338_v30 }
 0x12d   :  { %v251_v48 = vpop.xlane.xlu1 %250  ;;  %v254_v38 = vpop.xlane.xlu0 %253 }
 0x12e   :  { %775 = vrsqrt.f32 %v369_v32  ;;  %v339_v39 = vmul.f32 0.03125, %v251_v48  ;;  %v340_v42 = vmul.f32 0.03125, %v254_v38 }
 0x12f   :  { %777 = vrsqrt.f32 %v370_v34 }
 0x130   :  { %v371_v20 = vadd.f32 1e-05, %v339_v39  ;;  %v372_v46 = vadd.f32 1e-05, %v340_v42 }
 0x131   :  { %v257_v36 = vpop.xlane.xlu1 %256  ;;  %v260_v50 = vpop.xlane.xlu0 %259 }
 0x132   :  { %779 = vrsqrt.f32 %v371_v20  ;;  %v341_v52 = vmul.f32 0.03125, %v257_v36  ;;  %v342_v54 = vmul.f32 0.03125, %v260_v50 }
 0x133   :  { %781 = vrsqrt.f32 %v372_v46 }
 0x134   :  { %v774_v8 = vpop.eup %773  ;;  %v373_v24 = vadd.f32 1e-05, %v341_v52  ;;  %v374_v62 = vadd.f32 1e-05, %v342_v54 }
 0x135   :  { %v432_v40 = vmul.f32 %v774_v8, %v1082_v10  ;;  %v263_v3 = vpop.xlane.xlu1 %262  ;;  %v266_v56 = vpop.xlane.xlu0 %265 }
 0x136   :  { %783 = vrsqrt.f32 %v373_v24  ;;  %v343_v12 = vmul.f32 0.03125, %v263_v3  ;;  %v344_v14 = vmul.f32 0.03125, %v266_v56 }
 0x137   :  { %v471_v28 = vmul.f32 %v1276_v58, %v432_v40  ;;  %785 = vrsqrt.f32 %v374_v62 }
 0x138   :  { %v776_v18 = vpop.eup %775  ;;  %v375_v60 = vadd.f32 1e-05, %v343_v12  ;;  %v376_v61 = vadd.f32 1e-05, %v344_v14 }
 0x139   :  { %v778_v44 = vpop.eup %777  ;;  %v510_v10 = vadd.f32 %v1282_v6, %v471_v28  ;;  %v433_v22 = vmul.f32 %v776_v18, %v1092_v26  ;;  %v269_v23 = vpop.xlane.xlu1 %268 }
 0x13a   :  { %v272_v0 = vpop.xlane.xlu0 %271  ;;  %v434_v16 = vmul.f32 %v778_v44, %v1085_v11  ;;  %787 = vrsqrt.f32 %v375_v60  ;;  %v345_v30 = vmul.f32 0.03125, %v269_v23 }
 0x13b   :  { %v346_v32 = vmul.f32 0.03125, %v272_v0  ;;  %v741_v34 = vpack.c.bf16 %v510_v10, %v510_v10  ;;  %v472_v48 = vmul.f32 %v1276_v58, %v433_v22  ;;  %789 = vrsqrt.f32 %v376_v61 }
 0x13c   :  { %v780_v38 = vpop.eup %779  ;;  %v473_v39 = vmul.f32 %v1276_v58, %v434_v16  ;;  %v377_v42 = vadd.f32 1e-05, %v345_v30 }
 0x13d   :  { %v378_v20 = vadd.f32 1e-05, %v346_v32  ;;  %v782_v46 = vpop.eup %781  ;;  %671 = vst.msk [vmem:[%s1510_s3] sm:$0xf] %vm670_vm1, %v741_v34  ;;  %v511_v11 = vadd.f32 %v1282_v6, %v472_v48  ;;  %v435_v26 = vmul.f32 %v780_v38, %v1095_v27  ;;  %v275_v36 = vpop.xlane.xlu1 %274 }
 0x13e   :  { %v278_v50 = vpop.xlane.xlu0 %277  ;;  %v512_v52 = vadd.f32 %v1282_v6, %v473_v39  ;;  %v436_v54 = vmul.f32 %v782_v46, %v1104_v2  ;;  %791 = vrsqrt.f32 %v377_v42  ;;  %v347_v8 = vmul.f32 0.03125, %v275_v36 }
 0x13f   :  { %v742_v24 = vpack.c.bf16 %v511_v11, %v511_v11  ;;  %v474_v62 = vmul.f32 %v1276_v58, %v435_v26  ;;  %793 = vrsqrt.f32 %v378_v20  ;;  %v348_v40 = vmul.f32 0.03125, %v278_v50 }
 0x140   :  { %v784_v3 = vpop.eup %783  ;;  %v743_v56 = vpack.c.bf16 %v512_v52, %v512_v52  ;;  %v475_v12 = vmul.f32 %v1276_v58, %v436_v54  ;;  %v379_v14 = vadd.f32 1e-05, %v347_v8 }
 0x141   :  { %v786_v28 = vpop.eup %785  ;;  %672 = vst.msk [vmem:[%s1510_s3 + $0x4] sm:$0xf] %vm670_vm1, %v742_v24  ;;  %v513_v27 = vadd.f32 %v1282_v6, %v474_v62  ;;  %v437_v2 = vmul.f32 %v784_v3, %v1107_v5  ;;  %v380_v18 = vadd.f32 1e-05, %v348_v40  ;;  %v281_v60 = vpop.xlane.xlu1 %280 }
 0x142   :  { %v284_v61 = vpop.xlane.xlu0 %283  ;;  %673 = vst.msk [vmem:[%s1510_s3 + $0x8] sm:$0xf] %vm670_vm1, %v743_v56  ;;  %v514_v44 = vadd.f32 %v1282_v6, %v475_v12  ;;  %v438_v10 = vmul.f32 %v786_v28, %v1116_v55  ;;  %795 = vrsqrt.f32 %v379_v14  ;;  %v349_v22 = vmul.f32 0.03125, %v281_v60 }
 0x143   :  { %v744_v23 = vpack.c.bf16 %v513_v27, %v513_v27  ;;  %v476_v0 = vmul.f32 %v1276_v58, %v437_v2  ;;  %797 = vrsqrt.f32 %v380_v18  ;;  %v350_v16 = vmul.f32 0.03125, %v284_v61 }
 0x144   :  { %v788_v5 = vpop.eup %787  ;;  %v745_v30 = vpack.c.bf16 %v514_v44, %v514_v44  ;;  %v477_v32 = vmul.f32 %v1276_v58, %v438_v10  ;;  %v381_v34 = vadd.f32 1e-05, %v349_v22 }
 0x145   :  { %v790_v48 = vpop.eup %789  ;;  %674 = vst.msk [vmem:[%s1510_s3 + $0xc] sm:$0xf] %vm670_vm1, %v744_v23  ;;  %v515_v55 = vadd.f32 %v1282_v6, %v476_v0  ;;  %v439_v38 = vmul.f32 %v788_v5, %v1119_v9  ;;  %v382_v39 = vadd.f32 1e-05, %v350_v16  ;;  %v287_v42 = vpop.xlane.xlu1 %286 }
 0x146   :  { %v290_v20 = vpop.xlane.xlu0 %289  ;;  %675 = vst.msk [vmem:[%s1510_s3 + $0x10] sm:$0xf] %vm670_vm1, %v745_v30  ;;  %v516_v46 = vadd.f32 %v1282_v6, %v477_v32  ;;  %v440_v11 = vmul.f32 %v790_v48, %v1128_v7  ;;  %799 = vrsqrt.f32 %v381_v34  ;;  %v351_v26 = vmul.f32 0.03125, %v287_v42 }
 0x147   :  { %v746_v36 = vpack.c.bf16 %v515_v55, %v515_v55  ;;  %v478_v50 = vmul.f32 %v1276_v58, %v439_v38  ;;  %801 = vrsqrt.f32 %v382_v39  ;;  %v352_v52 = vmul.f32 0.03125, %v290_v20 }
 0x148   :  { %v792_v9 = vpop.eup %791  ;;  %v747_v54 = vpack.c.bf16 %v516_v46, %v516_v46  ;;  %v479_v8 = vmul.f32 %v1276_v58, %v440_v11  ;;  %v383_v24 = vadd.f32 1e-05, %v351_v26 }
 0x149   :  { %v794_v62 = vpop.eup %793  ;;  %676 = vst.msk [vmem:[%s1510_s3 + $0x14] sm:$0xf] %vm670_vm1, %v746_v36  ;;  %v517_v7 = vadd.f32 %v1282_v6, %v478_v50  ;;  %v441_v40 = vmul.f32 %v792_v9, %v1131_v13  ;;  %v384_v3 = vadd.f32 1e-05, %v352_v52  ;;  %v293_v56 = vpop.xlane.xlu1 %292 }
 0x14a   :  { %v296_v12 = vpop.xlane.xlu0 %295  ;;  %677 = vst.msk [vmem:[%s1510_s3 + $0x18] sm:$0xf] %vm670_vm1, %v747_v54  ;;  %v518_v14 = vadd.f32 %v1282_v6, %v479_v8  ;;  %v442_v28 = vmul.f32 %v794_v62, %v1140_v1  ;;  %803 = vrsqrt.f32 %v383_v24  ;;  %v353_v27 = vmul.f32 0.03125, %v293_v56 }
 0x14b   :  { %v748_v2 = vpack.c.bf16 %v517_v7, %v517_v7  ;;  %v480_v18 = vmul.f32 %v1276_v58, %v441_v40  ;;  %805 = vrsqrt.f32 %v384_v3  ;;  %v354_v60 = vmul.f32 0.03125, %v296_v12 }
 0x14c   :  { %v796_v13 = vpop.eup %795  ;;  %v749_v61 = vpack.c.bf16 %v518_v14, %v518_v14  ;;  %v481_v44 = vmul.f32 %v1276_v58, %v442_v28  ;;  %v385_v10 = vadd.f32 1e-05, %v353_v27 }
 0x14d   :  { %v798_v22 = vpop.eup %797  ;;  %678 = vst.msk [vmem:[%s1510_s3 + $0x1c] sm:$0xf] %vm670_vm1, %v748_v2  ;;  %v519_v1 = vadd.f32 %v1282_v6, %v480_v18  ;;  %v443_v23 = vmul.f32 %v796_v13, %v1143_v17  ;;  %v386_v0 = vadd.f32 1e-05, %v354_v60  ;;  %v299_v16 = vpop.xlane.xlu1 %298 }
 0x14e   :  { %v302_v5 = vpop.xlane.xlu0 %301  ;;  %679 = vst.msk [vmem:[%s1510_s3 + $0x20] sm:$0xf] %vm670_vm1, %v749_v61  ;;  %v520_v30 = vadd.f32 %v1282_v6, %v481_v44  ;;  %v444_v32 = vmul.f32 %v798_v22, %v1152_v43  ;;  %807 = vrsqrt.f32 %v385_v10  ;;  %v355_v34 = vmul.f32 0.03125, %v299_v16 }
 0x14f   :  { %v750_v48 = vpack.c.bf16 %v519_v1, %v519_v1  ;;  %v482_v55 = vmul.f32 %v1276_v58, %v443_v23  ;;  %809 = vrsqrt.f32 %v386_v0  ;;  %v356_v38 = vmul.f32 0.03125, %v302_v5 }
 0x150   :  { %v800_v17 = vpop.eup %799  ;;  %v751_v39 = vpack.c.bf16 %v520_v30, %v520_v30  ;;  %v483_v42 = vmul.f32 %v1276_v58, %v444_v32  ;;  %v387_v20 = vadd.f32 1e-05, %v355_v34 }
 0x151   :  { %v802_v46 = vpop.eup %801  ;;  %680 = vst.msk [vmem:[%s1510_s3 + $0x24] sm:$0xf] %vm670_vm1, %v750_v48  ;;  %v521_v43 = vadd.f32 %v1282_v6, %v482_v55  ;;  %v445_v11 = vmul.f32 %v800_v17, %v1155_v21  ;;  %v388_v26 = vadd.f32 1e-05, %v356_v38  ;;  %v305_v36 = vpop.xlane.xlu1 %304 }
 0x152   :  { %v308_v50 = vpop.xlane.xlu0 %307  ;;  %681 = vst.msk [vmem:[%s1510_s3 + $0x28] sm:$0xf] %vm670_vm1, %v751_v39  ;;  %v522_v52 = vadd.f32 %v1282_v6, %v483_v42  ;;  %v446_v9 = vmul.f32 %v802_v46, %v1164_v59  ;;  %811 = vrsqrt.f32 %v387_v20  ;;  %v357_v54 = vmul.f32 0.03125, %v305_v36 }
 0x153   :  { %v752_v8 = vpack.c.bf16 %v521_v43, %v521_v43  ;;  %v484_v24 = vmul.f32 %v1276_v58, %v445_v11  ;;  %813 = vrsqrt.f32 %v388_v26  ;;  %v358_v62 = vmul.f32 0.03125, %v308_v50 }
 0x154   :  { %v804_v21 = vpop.eup %803  ;;  %v753_v7 = vpack.c.bf16 %v522_v52, %v522_v52  ;;  %v485_v40 = vmul.f32 %v1276_v58, %v446_v9  ;;  %v389_v3 = vadd.f32 1e-05, %v357_v54 }
 0x155   :  { %v806_v56 = vpop.eup %805  ;;  %682 = vst.msk [vmem:[%s1510_s3 + $0x2c] sm:$0xf] %vm670_vm1, %v752_v8  ;;  %v523_v59 = vadd.f32 %v1282_v6, %v484_v24  ;;  %v447_v12 = vmul.f32 %v804_v21, %v1167_v25  ;;  %v390_v14 = vadd.f32 1e-05, %v358_v62  ;;  %v311_v28 = vpop.xlane.xlu1 %310 }
 0x156   :  { %v314_v27 = vpop.xlane.xlu0 %313  ;;  %683 = vst.msk [vmem:[%s1510_s3 + $0x30] sm:$0xf] %vm670_vm1, %v753_v7  ;;  %v524_v2 = vadd.f32 %v1282_v6, %v485_v40  ;;  %v448_v18 = vmul.f32 %v806_v56, %v1176_v15  ;;  %815 = vrsqrt.f32 %v389_v3  ;;  %v359_v60 = vmul.f32 0.03125, %v311_v28 }
 0x157   :  { %v754_v13 = vpack.c.bf16 %v523_v59, %v523_v59  ;;  %v486_v61 = vmul.f32 %v1276_v58, %v447_v12  ;;  %817 = vrsqrt.f32 %v390_v14  ;;  %v360_v44 = vmul.f32 0.03125, %v314_v27 }
 0x158   :  { %v808_v25 = vpop.eup %807  ;;  %v755_v10 = vpack.c.bf16 %v524_v2, %v524_v2  ;;  %v487_v22 = vmul.f32 %v1276_v58, %v448_v18  ;;  %v391_v1 = vadd.f32 1e-05, %v359_v60 }
 0x159   :  { %v810_v23 = vpop.eup %809  ;;  %684 = vst.msk [vmem:[%s1510_s3 + $0x34] sm:$0xf] %vm670_vm1, %v754_v13  ;;  %v525_v15 = vadd.f32 %v1282_v6, %v486_v61  ;;  %v449_v0 = vmul.f32 %v808_v25, %v1179_v29  ;;  %v392_v16 = vadd.f32 1e-05, %v360_v44  ;;  %v317_v5 = vpop.xlane.xlu1 %316 }
 0x15a   :  { %v320_v30 = vpop.xlane.xlu0 %319  ;;  %685 = vst.msk [vmem:[%s1510_s3 + $0x38] sm:$0xf] %vm670_vm1, %v755_v10  ;;  %v526_v32 = vadd.f32 %v1282_v6, %v487_v22  ;;  %v450_v34 = vmul.f32 %v810_v23, %v1188_v31  ;;  %819 = vrsqrt.f32 %v391_v1  ;;  %v361_v48 = vmul.f32 0.03125, %v317_v5 }
 0x15b   :  { %v756_v55 = vpack.c.bf16 %v525_v15, %v525_v15  ;;  %v488_v38 = vmul.f32 %v1276_v58, %v449_v0  ;;  %821 = vrsqrt.f32 %v392_v16  ;;  %v362_v17 = vmul.f32 0.03125, %v320_v30 }
 0x15c   :  { %v812_v29 = vpop.eup %811  ;;  %v757_v39 = vpack.c.bf16 %v526_v32, %v526_v32  ;;  %v489_v42 = vmul.f32 %v1276_v58, %v450_v34  ;;  %v393_v20 = vadd.f32 1e-05, %v361_v48 }
 0x15d   :  { %v814_v46 = vpop.eup %813  ;;  %686 = vst.msk [vmem:[%s1510_s3 + $0x3c] sm:$0xf] %vm670_vm1, %v756_v55  ;;  %v527_v31 = vadd.f32 %v1282_v6, %v488_v38  ;;  %v451_v43 = vmul.f32 %v812_v29, %v1191_v33  ;;  %v394_v11 = vadd.f32 1e-05, %v362_v17  ;;  %v323_v26 = vpop.xlane.xlu1 %322 }
 0x15e   :  { %v326_v36 = vpop.xlane.xlu0 %325  ;;  %687 = vst.msk [vmem:[%s1510_s3 + $0x40] sm:$0xf] %vm670_vm1, %v757_v39  ;;  %v528_v50 = vadd.f32 %v1282_v6, %v489_v42  ;;  %v452_v52 = vmul.f32 %v814_v46, %v1200_v47  ;;  %823 = vrsqrt.f32 %v393_v20  ;;  %v363_v9 = vmul.f32 0.03125, %v323_v26 }
 0x15f   :  { %v758_v54 = vpack.c.bf16 %v527_v31, %v527_v31  ;;  %v490_v8 = vmul.f32 %v1276_v58, %v451_v43  ;;  %825 = vrsqrt.f32 %v394_v11  ;;  %v364_v24 = vmul.f32 0.03125, %v326_v36 }
 0x160   :  { %v816_v33 = vpop.eup %815  ;;  %v759_v62 = vpack.c.bf16 %v528_v50, %v528_v50  ;;  %v491_v21 = vmul.f32 %v1276_v58, %v452_v52  ;;  %v395_v7 = vadd.f32 1e-05, %v363_v9 }
 0x161   :  { %v818_v40 = vpop.eup %817  ;;  %688 = vst.msk [vmem:[%s1510_s3 + $0x44] sm:$0xf] %vm670_vm1, %v758_v54  ;;  %v529_v47 = vadd.f32 %v1282_v6, %v490_v8  ;;  %v453_v3 = vmul.f32 %v816_v33, %v1203_v37  ;;  %v396_v56 = vadd.f32 1e-05, %v364_v24  ;;  %v329_v59 = vpop.xlane.xlu1 %328 }
 0x162   :  { %v332_v12 = vpop.xlane.xlu0 %331  ;;  %689 = vst.msk [vmem:[%s1510_s3 + $0x48] sm:$0xf] %vm670_vm1, %v759_v62  ;;  %v530_v14 = vadd.f32 %v1282_v6, %v491_v21  ;;  %v454_v28 = vmul.f32 %v818_v40, %v1212_v63  ;;  %827 = vrsqrt.f32 %v395_v7  ;;  %v365_v27 = vmul.f32 0.03125, %v329_v59 }
 0x163   :  { %v760_v2 = vpack.c.bf16 %v529_v47, %v529_v47  ;;  %v492_v18 = vmul.f32 %v1276_v58, %v453_v3  ;;  %829 = vrsqrt.f32 %v396_v56  ;;  %v366_v60 = vmul.f32 0.03125, %v332_v12 }
 0x164   :  { %v820_v37 = vpop.eup %819  ;;  %v761_v13 = vpack.c.bf16 %v530_v14, %v530_v14  ;;  %v493_v61 = vmul.f32 %v1276_v58, %v454_v28  ;;  %v397_v44 = vadd.f32 1e-05, %v365_v27 }
 0x165   :  { %v822_v25 = vpop.eup %821  ;;  %690 = vst.msk [vmem:[%s1510_s3 + $0x4c] sm:$0xf] %vm670_vm1, %v760_v2  ;;  %v531_v63 = vadd.f32 %v1282_v6, %v492_v18  ;;  %v455_v10 = vmul.f32 %v820_v37, %v1215_v41  ;;  %v398_v22 = vadd.f32 1e-05, %v366_v60  ;;  %v335_v1 = vpop.xlane.xlu1 %334 }
 0x166   :  { %691 = vst.msk [vmem:[%s1510_s3 + $0x50] sm:$0xf] %vm670_vm1, %v761_v13  ;;  %v532_v23 = vadd.f32 %v1282_v6, %v493_v61  ;;  %v456_v15 = vmul.f32 %v822_v25, %v1224_v19  ;;  %831 = vrsqrt.f32 %v397_v44  ;;  %v367_v0 = vmul.f32 0.03125, %v335_v1 }
 0x167   :  { %v762_v16 = vpack.c.bf16 %v531_v63, %v531_v63  ;;  %v494_v5 = vmul.f32 %v1276_v58, %v455_v10  ;;  %833 = vrsqrt.f32 %v398_v22 }
 0x168   :  { %v824_v30 = vpop.eup %823  ;;  %v763_v32 = vpack.c.bf16 %v532_v23, %v532_v23  ;;  %v495_v41 = vmul.f32 %v1276_v58, %v456_v15  ;;  %v399_v34 = vadd.f32 1e-05, %v367_v0 }
 0x169   :  { %v826_v48 = vpop.eup %825  ;;  %692 = vst.msk [vmem:[%s1510_s3 + $0x54] sm:$0xf] %vm670_vm1, %v762_v16  ;;  %v533_v55 = vadd.f32 %v1282_v6, %v494_v5  ;;  %v457_v19 = vmul.f32 %v824_v30, %v1227_v45 }
 0x16a   :  { %693 = vst.msk [vmem:[%s1510_s3 + $0x58] sm:$0xf] %vm670_vm1, %v763_v32  ;;  %v534_v38 = vadd.f32 %v1282_v6, %v495_v41  ;;  %v458_v17 = vmul.f32 %v826_v48, %v1236_v35  ;;  %835 = vrsqrt.f32 %v399_v34 }
 0x16b   :  { %v764_v29 = vpack.c.bf16 %v533_v55, %v533_v55  ;;  %v496_v39 = vmul.f32 %v1276_v58, %v457_v19 }
 0x16c   :  { %v828_v42 = vpop.eup %827  ;;  %v765_v20 = vpack.c.bf16 %v534_v38, %v534_v38  ;;  %v497_v46 = vmul.f32 %v1276_v58, %v458_v17 }
 0x16d   :  { %v830_v31 = vpop.eup %829  ;;  %694 = vst.msk [vmem:[%s1510_s3 + $0x5c] sm:$0xf] %vm670_vm1, %v764_v29  ;;  %v535_v45 = vadd.f32 %v1282_v6, %v496_v39  ;;  %v459_v43 = vmul.f32 %v828_v42, %v1239_v49 }
 0x16e   :  { %695 = vst.msk [vmem:[%s1510_s3 + $0x60] sm:$0xf] %vm670_vm1, %v765_v20  ;;  %v536_v35 = vadd.f32 %v1282_v6, %v497_v46  ;;  %v460_v11 = vmul.f32 %v830_v31, %v1248_v51 }
 0x16f   :  { %v766_v26 = vpack.c.bf16 %v535_v45, %v535_v45  ;;  %v498_v36 = vmul.f32 %v1276_v58, %v459_v43 }
 0x170   :  { %v832_v50 = vpop.eup %831  ;;  %v767_v52 = vpack.c.bf16 %v536_v35, %v536_v35  ;;  %v499_v9 = vmul.f32 %v1276_v58, %v460_v11 }
 0x171   :  { %v834_v54 = vpop.eup %833  ;;  %696 = vst.msk [vmem:[%s1510_s3 + $0x64] sm:$0xf] %vm670_vm1, %v766_v26  ;;  %v537_v49 = vadd.f32 %v1282_v6, %v498_v36  ;;  %v461_v8 = vmul.f32 %v832_v50, %v1251_v53 }
 0x172   :  { %697 = vst.msk [vmem:[%s1510_s3 + $0x68] sm:$0xf] %vm670_vm1, %v767_v52  ;;  %v538_v51 = vadd.f32 %v1282_v6, %v499_v9  ;;  %v462_v24 = vmul.f32 %v834_v54, %v1260_v4 }
 0x173   :  { %v768_v33 = vpack.c.bf16 %v537_v49, %v537_v49  ;;  %v500_v62 = vmul.f32 %v1276_v58, %v461_v8 }
 0x174   :  { %v836_v21 = vpop.eup %835  ;;  %v769_v7 = vpack.c.bf16 %v538_v51, %v538_v51  ;;  %v501_v40 = vmul.f32 %v1276_v58, %v462_v24 }
 0x175   :  { %698 = vst.msk [vmem:[%s1510_s3 + $0x6c] sm:$0xf] %vm670_vm1, %v768_v33  ;;  %v539_v53 = vadd.f32 %v1282_v6, %v500_v62  ;;  %v463_v47 = vmul.f32 %v836_v21, %v1263_v57 }
 0x176   :  { %699 = vst.msk [vmem:[%s1510_s3 + $0x70] sm:$0xf] %vm670_vm1, %v769_v7  ;;  %v540_v4 = vadd.f32 %v1282_v6, %v501_v40 }
 0x177   :  { %v770_v3 = vpack.c.bf16 %v539_v53, %v539_v53  ;;  %v502_v56 = vmul.f32 %v1276_v58, %v463_v47 }
 0x178   :  { %v771_v59 = vpack.c.bf16 %v540_v4, %v540_v4 }
 0x179   :  { %700 = vst.msk [vmem:[%s1510_s3 + $0x74] sm:$0xf] %vm670_vm1, %v770_v3  ;;  %v541_v12 = vadd.f32 %v1282_v6, %v502_v56 }
 0x17a   :  { %701 = vst.msk [vmem:[%s1510_s3 + $0x78] sm:$0xf] %vm670_vm1, %v771_v59 }
 0x17b   :  { %v772_v57 = vpack.c.bf16 %v541_v12, %v541_v12 }
 0x17d   :  { %702 = vst.msk [vmem:[%s1510_s3 + $0x7c] sm:$0xf] %vm670_vm1, %v772_v57 }

</bundles_post_ra>
